<compile_context>
chip_gen: v6e
topology: v6e:2x2x1
jax: 0.10.0
libtpu: 0.0.40
codegen_flags: <defaults>
</compile_context>

<pallas_src>
import functools

import jax
import jax.numpy as jnp
from jax import lax
from jax.experimental import pallas as pl
from jax.experimental.pallas import tpu as pltpu


def _spubert_output_kernel(x_ref, res_ref, w_ref, b_ref, g_ref, beta_ref,
                           o_ref, *, eps, sub_rows, num_sub):
    """One (TM, I) row tile -> (TM, H) output tile.

    x_ref:    (TM, I)   intermediate activations (native dtype -> MXU)
    res_ref:  (TM, H)   residual input_tensor
    w_ref:    (I, H)    pre-transposed dense weight (canonical K x N RHS)
    b_ref:    (1, H)    dense bias
    g_ref:    (1, H)    LayerNorm gamma
    beta_ref: (1, H)    LayerNorm beta
    o_ref:    (TM, H)
    """
    w = w_ref[...]
    b = b_ref[...].astype(jnp.float32)
    g = g_ref[...].astype(jnp.float32)
    bt = beta_ref[...].astype(jnp.float32)

    def sub_tile(j, carry):
        if num_sub > 1:
            r0 = pl.multiple_of(j * sub_rows, sub_rows)
        else:
            r0 = 0
        rows = pl.ds(r0, sub_rows)
        # Canonical [m, K] @ [K, N] on the MXU; f32 accumulation.
        y = jnp.dot(x_ref[rows, :], w, preferred_element_type=jnp.float32)
        y = y + b
        # TODO(synk): training-mode dropout omitted (eval-mode identity).
        y = y + res_ref[rows, :].astype(jnp.float32)
        # LayerNorm over the hidden dim (f32; eps inside the sqrt, like torch).
        mean = jnp.mean(y, axis=-1, keepdims=True)
        cent = y - mean
        var = jnp.mean(cent * cent, axis=-1, keepdims=True)
        y = cent * lax.rsqrt(var + eps)
        y = y * g + bt
        o_ref[rows, :] = y.astype(o_ref.dtype)
        return carry

    # Unrolled sub-tiles: LayerNorm epilogue of sub-tile j co-issues with the
    # MXU pushes of sub-tile j+1.
    lax.fori_loop(0, num_sub, sub_tile, 0, unroll=True)


def spubert_output(hidden_states, input_tensor, weight, bias, gamma, beta,
                   *, eps=1e-12, block_rows=None):
    """SPUBERTOutput forward, eval mode (dropout == identity).

    hidden_states: (B, S, I)   input to the dense layer
    input_tensor:  (B, S, H)   residual
    weight:        (H, I)      torch nn.Linear layout (out_features, in_features)
    bias, gamma, beta: (H,)
    """
    B, S, I = hidden_states.shape
    H = input_tensor.shape[-1]
    M = B * S

    x = hidden_states.reshape(M, I)
    res = input_tensor.reshape(M, H)
    # One-time (amortized) transpose so the kernel sees a lane-major (K, N)
    # RHS; a real model would store the weight pre-transposed.
    w_t = jnp.transpose(weight)  # (I, H)
    b2 = bias.reshape(1, H)
    g2 = gamma.reshape(1, H)
    be2 = beta.reshape(1, H)

    # ---- generation-aware tiling & VMEM budget ----
    try:
        vmem_cap = int(pltpu.get_tpu_info().vmem_capacity_bytes)
    except Exception:  # query unsupported -> conservative (v7x-like) budget
        vmem_cap = 64 << 20

    if block_rows is None:
        # 128 MiB VMEM (v5e/v6e): TM=512; 64 MiB per-TC (v7x): TM=256.
        block_rows = 512 if vmem_cap >= (100 << 20) else 256

    TM = min(block_rows, M)
    if TM == M and M > 8:
        # Guarantee >= 2 grid steps so the "parallel" axis can span both v7x
        # TensorCores and the DMA pipeline has something to overlap.
        half = (M // 2) // 8 * 8
        if half >= 8:
            TM = half
    grid_m = pl.cdiv(M, TM)

    # In-kernel sub-tiling for MXU / LayerNorm-epilogue overlap.
    if TM >= 256 and TM % 128 == 0:
        sub_rows = 128
    else:
        sub_rows = TM
    num_sub = TM // sub_rows

    x_it = jnp.dtype(x.dtype).itemsize
    res_it = jnp.dtype(res.dtype).itemsize
    w_it = jnp.dtype(w_t.dtype).itemsize
    out_it = x_it

    kernel = functools.partial(_spubert_output_kernel, eps=float(eps),
                               sub_rows=sub_rows, num_sub=num_sub)

    cost = pl.CostEstimate(
        flops=2 * M * I * H,
        transcendentals=M,  # one rsqrt per row
        bytes_accessed=(M * I * x_it + M * H * res_it + M * H * out_it
                        + I * H * w_it + 3 * H * 4),
    )

    def _build_and_call(single_buffer_consts):
        def const_spec(shape):
            idx = lambda i: (0,) * len(shape)
            if single_buffer_consts:
                # Loop-invariant operand: one resident buffer, not two.
                return pl.BlockSpec(shape, idx, pipeline_mode=pl.Buffered(1))
            return pl.BlockSpec(shape, idx)

        w_bufs = 1 if single_buffer_consts else 2
        vmem_need = (w_bufs * (I * H * w_it + 3 * H * 4)   # resident consts
                     + 2 * TM * I * x_it                   # x, double-buffered
                     + 2 * TM * H * res_it                 # residual
                     + 2 * TM * H * out_it)                # output
        vmem_limit = int(min(max(int(vmem_need * 1.25) + (2 << 20), 16 << 20),
                             100 << 20, int(vmem_cap * 0.9)))

        return pl.pallas_call(
            kernel,
            out_shape=jax.ShapeDtypeStruct((M, H), hidden_states.dtype),
            grid=(grid_m,),
            in_specs=[
                pl.BlockSpec((TM, I), lambda i: (i, 0)),   # activations (tiled)
                pl.BlockSpec((TM, H), lambda i: (i, 0)),   # residual (tiled)
                const_spec((I, H)),                        # weight (resident)
                const_spec((1, H)),                        # bias
                const_spec((1, H)),                        # gamma
                const_spec((1, H)),                        # beta
            ],
            out_specs=pl.BlockSpec((TM, H), lambda i: (i, 0)),
            compiler_params=pltpu.CompilerParams(
                dimension_semantics=("parallel",),
                vmem_limit_bytes=vmem_limit),
            cost_estimate=cost,
        )(x, res, w_t, b2, g2, be2)

    try:
        out = _build_and_call(True)
    except Exception:
        # This jax/Mosaic build rejected pipeline_mode=pl.Buffered(1) on the
        # loop-invariant operands; fall back to default double-buffering.
        out = _build_and_call(False)

    return out.reshape(B, S, H)


if __name__ == "__main__":
    # Small but lane-dense shapes (H = 128 fills the 128-lane vreg).
    B, S, I, H = 2, 8, 256, 128
    eps = 1e-12
    key = jax.random.PRNGKey(0)
    k_x, k_r, k_w, k_b, k_g, k_be = jax.random.split(key, 6)

    hidden_states = jax.random.normal(k_x, (B, S, I), dtype=jnp.float32)
    input_tensor = jax.random.normal(k_r, (B, S, H), dtype=jnp.float32)
    # nn.Linear(intermediate_size, hidden_size): weight (H, I), bias (H,)
    weight = jax.random.normal(k_w, (H, I), dtype=jnp.float32) * 0.02
    bias = jax.random.normal(k_b, (H,), dtype=jnp.float32) * 0.02
    gamma = 1.0 + 0.1 * jax.random.normal(k_g, (H,), dtype=jnp.float32)
    beta = 0.1 * jax.random.normal(k_be, (H,), dtype=jnp.float32)

    out = spubert_output(hidden_states, input_tensor, weight, bias,
                         gamma, beta, eps=eps)
    out = jax.block_until_ready(out)

    # Reference in plain JAX (eval-mode dropout == identity).
    y = jnp.einsum("bsi,hi->bsh", hidden_states, weight) + bias
    y = y + input_tensor
    mean = y.mean(-1, keepdims=True)
    var = ((y - mean) ** 2).mean(-1, keepdims=True)
    ref = (y - mean) / jnp.sqrt(var + eps) * gamma + beta

    assert out.shape == (B, S, H)
    max_err = float(jnp.max(jnp.abs(out - ref)))
    assert jnp.allclose(out, ref, atol=5e-3, rtol=5e-3), (
        f"mismatch vs reference: max abs err {max_err:.3e}")
    print("KERNEL_OK")
</pallas_src>

<mosaic_0001>
module attributes {stable_mosaic.version = 11 : i64} {
  func.func @_spubert_output_kernel(%arg0: i32, %arg1: memref<8x256xf32, #tpu.memory_space<vmem>>, %arg2: memref<8x128xf32, #tpu.memory_space<vmem>>, %arg3: memref<256x128xf32, #tpu.memory_space<vmem>>, %arg4: memref<1x128xf32, #tpu.memory_space<vmem>>, %arg5: memref<1x128xf32, #tpu.memory_space<vmem>>, %arg6: memref<1x128xf32, #tpu.memory_space<vmem>>, %arg7: memref<8x128xf32, #tpu.memory_space<vmem>>) attributes {dimension_semantics = [#tpu.dimension_semantics<parallel>], iteration_bounds = array<i64: 2>, scalar_prefetch = 0 : i64, scratch_operands = 0 : i64, tpu.core_type = #tpu.core_type<tc>, window_params = [{transform_indices = @transform_0, window_bounds = array<i64: 8, 256>}, {transform_indices = @transform_1, window_bounds = array<i64: 8, 128>}, {pipeline_mode = #tpu.pipeline_mode<synchronous>, transform_indices = @transform_2, window_bounds = array<i64: 256, 128>}, {pipeline_mode = #tpu.pipeline_mode<synchronous>, transform_indices = @transform_3, window_bounds = array<i64: 1, 128>}, {pipeline_mode = #tpu.pipeline_mode<synchronous>, transform_indices = @transform_4, window_bounds = array<i64: 1, 128>}, {pipeline_mode = #tpu.pipeline_mode<synchronous>, transform_indices = @transform_5, window_bounds = array<i64: 1, 128>}, {transform_indices = @transform_6, window_bounds = array<i64: 8, 128>}]} {
    %c0 = arith.constant 0 : index
    %c0_0 = arith.constant 0 : index
    %0 = vector.load %arg3[%c0, %c0_0] : memref<256x128xf32, #tpu.memory_space<vmem>>, vector<256x128xf32>
    %c0_1 = arith.constant 0 : index
    %c0_2 = arith.constant 0 : index
    %1 = vector.load %arg4[%c0_1, %c0_2] : memref<1x128xf32, #tpu.memory_space<vmem>>, vector<1x128xf32>
    %c0_3 = arith.constant 0 : index
    %c0_4 = arith.constant 0 : index
    %2 = vector.load %arg5[%c0_3, %c0_4] : memref<1x128xf32, #tpu.memory_space<vmem>>, vector<1x128xf32>
    %c0_5 = arith.constant 0 : index
    %c0_6 = arith.constant 0 : index
    %3 = vector.load %arg6[%c0_5, %c0_6] : memref<1x128xf32, #tpu.memory_space<vmem>>, vector<1x128xf32>
    %c0_i32 = arith.constant 0 : i32
    %c0_7 = arith.constant 0 : index
    %c0_8 = arith.constant 0 : index
    %4 = vector.load %arg1[%c0_7, %c0_8] : memref<8x256xf32, #tpu.memory_space<vmem>>, vector<8x256xf32>
    %cst = arith.constant dense<0.000000e+00> : vector<8x128xf32>
    %5 = tpu.matmul %4, %0, %cst {dimension_numbers = #tpu.dot_dimension_numbers<[1], [0], [0], [1], [0, 0, 1, 1], [], []>} : vector<8x256xf32>, vector<256x128xf32>, vector<8x128xf32> -> vector<8x128xf32>
    %6 = vector.broadcast %1 : vector<1x128xf32> to vector<8x128xf32>
    %7 = arith.addf %5, %6 : vector<8x128xf32>
    %c0_9 = arith.constant 0 : index
    %c0_10 = arith.constant 0 : index
    %8 = vector.load %arg2[%c0_9, %c0_10] : memref<8x128xf32, #tpu.memory_space<vmem>>, vector<8x128xf32>
    %9 = arith.addf %7, %8 : vector<8x128xf32>
    %cst_11 = arith.constant dense<0.000000e+00> : vector<8xf32>
    %10 = vector.multi_reduction <add>, %9, %cst_11 [1] : vector<8x128xf32> to vector<8xf32>
    %11 = vector.shape_cast %10 : vector<8xf32> to vector<8x1xf32>
    %cst_12 = arith.constant 1.280000e+02 : f32
    %12 = vector.broadcast %cst_12 : f32 to vector<8x1xf32>
    %13 = arith.divf %11, %12 : vector<8x1xf32>
    %14 = vector.broadcast %13 : vector<8x1xf32> to vector<8x128xf32>
    %15 = arith.subf %9, %14 : vector<8x128xf32>
    %16 = arith.mulf %15, %15 : vector<8x128xf32>
    %cst_13 = arith.constant dense<0.000000e+00> : vector<8xf32>
    %17 = vector.multi_reduction <add>, %16, %cst_13 [1] : vector<8x128xf32> to vector<8xf32>
    %18 = vector.shape_cast %17 : vector<8xf32> to vector<8x1xf32>
    %cst_14 = arith.constant 1.280000e+02 : f32
    %19 = vector.broadcast %cst_14 : f32 to vector<8x1xf32>
    %20 = arith.divf %18, %19 : vector<8x1xf32>
    %cst_15 = arith.constant 9.99999996E-13 : f32
    %21 = vector.broadcast %cst_15 : f32 to vector<8x1xf32>
    %22 = arith.addf %20, %21 : vector<8x1xf32>
    %23 = math.rsqrt %22 : vector<8x1xf32>
    %24 = vector.broadcast %23 : vector<8x1xf32> to vector<8x128xf32>
    %25 = arith.mulf %15, %24 : vector<8x128xf32>
    %26 = vector.broadcast %2 : vector<1x128xf32> to vector<8x128xf32>
    %27 = arith.mulf %25, %26 : vector<8x128xf32>
    %28 = vector.broadcast %3 : vector<1x128xf32> to vector<8x128xf32>
    %29 = arith.addf %27, %28 : vector<8x128xf32>
    %c0_16 = arith.constant 0 : index
    %c0_17 = arith.constant 0 : index
    %30 = vector.load %arg7[%c0_16, %c0_17] : memref<8x128xf32, #tpu.memory_space<vmem>>, vector<8x128xf32>
    tpu.vector_store %arg7[%c0_16, %c0_17], %29 {strides = array<i32>} : memref<8x128xf32, #tpu.memory_space<vmem>>, vector<8x128xf32>,
    return
  }
  func.func @transform_0(%arg0: i32) -> (i32, i32) {
    %c0_i32 = arith.constant 0 : i32
    %c0_i32_0 = arith.constant 0 : i32
    return %arg0, %c0_i32 : i32, i32
  }
  func.func @transform_1(%arg0: i32) -> (i32, i32) {
    %c0_i32 = arith.constant 0 : i32
    %c0_i32_0 = arith.constant 0 : i32
    return %arg0, %c0_i32 : i32, i32
  }
  func.func @transform_2(%arg0: i32) -> (i32, i32) {
    %c0_i32 = arith.constant 0 : i32
    %c0_i32_0 = arith.constant 0 : i32
    %c0_i32_1 = arith.constant 0 : i32
    return %c0_i32, %c0_i32_0 : i32, i32
  }
  func.func @transform_3(%arg0: i32) -> (i32, i32) {
    %c0_i32 = arith.constant 0 : i32
    %c0_i32_0 = arith.constant 0 : i32
    %c0_i32_1 = arith.constant 0 : i32
    return %c0_i32, %c0_i32_0 : i32, i32
  }
  func.func @transform_4(%arg0: i32) -> (i32, i32) {
    %c0_i32 = arith.constant 0 : i32
    %c0_i32_0 = arith.constant 0 : i32
    %c0_i32_1 = arith.constant 0 : i32
    return %c0_i32, %c0_i32_0 : i32, i32
  }
  func.func @transform_5(%arg0: i32) -> (i32, i32) {
    %c0_i32 = arith.constant 0 : i32
    %c0_i32_0 = arith.constant 0 : i32
    %c0_i32_1 = arith.constant 0 : i32
    return %c0_i32, %c0_i32_0 : i32, i32
  }
  func.func @transform_6(%arg0: i32) -> (i32, i32) {
    %c0_i32 = arith.constant 0 : i32
    %c0_i32_0 = arith.constant 0 : i32
    return %arg0, %c0_i32 : i32, i32
  }
}

module attributes {stable_mosaic.version = 11 : i64} {
  func.func @_spubert_output_kernel(%arg0: i32, %arg1: memref<8x256xf32, #tpu.memory_space<vmem>>, %arg2: memref<8x128xf32, #tpu.memory_space<vmem>>, %arg3: memref<256x128xf32, #tpu.memory_space<vmem>>, %arg4: memref<1x128xf32, #tpu.memory_space<vmem>>, %arg5: memref<1x128xf32, #tpu.memory_space<vmem>>, %arg6: memref<1x128xf32, #tpu.memory_space<vmem>>, %arg7: memref<8x128xf32, #tpu.memory_space<vmem>>) attributes {dimension_semantics = [#tpu.dimension_semantics<parallel>], iteration_bounds = array<i64: 2>, scalar_prefetch = 0 : i64, scratch_operands = 0 : i64, tpu.core_type = #tpu.core_type<tc>, window_params = [{transform_indices = @transform_0, window_bounds = array<i64: 8, 256>}, {transform_indices = @transform_1, window_bounds = array<i64: 8, 128>}, {pipeline_mode = #tpu.pipeline_mode<synchronous>, transform_indices = @transform_2, window_bounds = array<i64: 256, 128>}, {pipeline_mode = #tpu.pipeline_mode<synchronous>, transform_indices = @transform_3, window_bounds = array<i64: 1, 128>}, {pipeline_mode = #tpu.pipeline_mode<synchronous>, transform_indices = @transform_4, window_bounds = array<i64: 1, 128>}, {pipeline_mode = #tpu.pipeline_mode<synchronous>, transform_indices = @transform_5, window_bounds = array<i64: 1, 128>}, {transform_indices = @transform_6, window_bounds = array<i64: 8, 128>}]} {
    %c0 = arith.constant 0 : index
    %c0_0 = arith.constant 0 : index
    %0 = vector.load %arg3[%c0, %c0_0] : memref<256x128xf32, #tpu.memory_space<vmem>>, vector<256x128xf32>
    %c0_1 = arith.constant 0 : index
    %c0_2 = arith.constant 0 : index
    %1 = vector.load %arg4[%c0_1, %c0_2] : memref<1x128xf32, #tpu.memory_space<vmem>>, vector<1x128xf32>
    %c0_3 = arith.constant 0 : index
    %c0_4 = arith.constant 0 : index
    %2 = vector.load %arg5[%c0_3, %c0_4] : memref<1x128xf32, #tpu.memory_space<vmem>>, vector<1x128xf32>
    %c0_5 = arith.constant 0 : index
    %c0_6 = arith.constant 0 : index
    %3 = vector.load %arg6[%c0_5, %c0_6] : memref<1x128xf32, #tpu.memory_space<vmem>>, vector<1x128xf32>
    %c0_i32 = arith.constant 0 : i32
    %c0_7 = arith.constant 0 : index
    %c0_8 = arith.constant 0 : index
    %4 = vector.load %arg1[%c0_7, %c0_8] : memref<8x256xf32, #tpu.memory_space<vmem>>, vector<8x256xf32>
    %cst = arith.constant dense<0.000000e+00> : vector<8x128xf32>
    %5 = tpu.matmul %4, %0, %cst {dimension_numbers = #tpu.dot_dimension_numbers<[1], [0], [0], [1], [0, 0, 1, 1], [], []>} : vector<8x256xf32>, vector<256x128xf32>, vector<8x128xf32> -> vector<8x128xf32>
    %6 = vector.broadcast %1 : vector<1x128xf32> to vector<8x128xf32>
    %7 = arith.addf %5, %6 : vector<8x128xf32>
    %c0_9 = arith.constant 0 : index
    %c0_10 = arith.constant 0 : index
    %8 = vector.load %arg2[%c0_9, %c0_10] : memref<8x128xf32, #tpu.memory_space<vmem>>, vector<8x128xf32>
    %9 = arith.addf %7, %8 : vector<8x128xf32>
    %cst_11 = arith.constant dense<0.000000e+00> : vector<8xf32>
    %10 = vector.multi_reduction <add>, %9, %cst_11 [1] : vector<8x128xf32> to vector<8xf32>
    %11 = vector.shape_cast %10 : vector<8xf32> to vector<8x1xf32>
    %cst_12 = arith.constant 1.280000e+02 : f32
    %12 = vector.broadcast %cst_12 : f32 to vector<8x1xf32>
    %13 = arith.divf %11, %12 : vector<8x1xf32>
    %14 = vector.broadcast %13 : vector<8x1xf32> to vector<8x128xf32>
    %15 = arith.subf %9, %14 : vector<8x128xf32>
    %16 = arith.mulf %15, %15 : vector<8x128xf32>
    %cst_13 = arith.constant dense<0.000000e+00> : vector<8xf32>
    %17 = vector.multi_reduction <add>, %16, %cst_13 [1] : vector<8x128xf32> to vector<8xf32>
    %18 = vector.shape_cast %17 : vector<8xf32> to vector<8x1xf32>
    %cst_14 = arith.constant 1.280000e+02 : f32
    %19 = vector.broadcast %cst_14 : f32 to vector<8x1xf32>
    %20 = arith.divf %18, %19 : vector<8x1xf32>
    %cst_15 = arith.constant 9.99999996E-13 : f32
    %21 = vector.broadcast %cst_15 : f32 to vector<8x1xf32>
    %22 = arith.addf %20, %21 : vector<8x1xf32>
    %23 = math.rsqrt %22 : vector<8x1xf32>
    %24 = vector.broadcast %23 : vector<8x1xf32> to vector<8x128xf32>
    %25 = arith.mulf %15, %24 : vector<8x128xf32>
    %26 = vector.broadcast %2 : vector<1x128xf32> to vector<8x128xf32>
    %27 = arith.mulf %25, %26 : vector<8x128xf32>
    %28 = vector.broadcast %3 : vector<1x128xf32> to vector<8x128xf32>
    %29 = arith.addf %27, %28 : vector<8x128xf32>
    %c0_16 = arith.constant 0 : index
    %c0_17 = arith.constant 0 : index
    %30 = vector.load %arg7[%c0_16, %c0_17] : memref<8x128xf32, #tpu.memory_space<vmem>>, vector<8x128xf32>
    tpu.vector_store %arg7[%c0_16, %c0_17], %29 {strides = array<i32>} : memref<8x128xf32, #tpu.memory_space<vmem>>, vector<8x128xf32>,
    return
  }
  func.func @transform_0(%arg0: i32) -> (i32, i32) {
    %c0_i32 = arith.constant 0 : i32
    %c0_i32_0 = arith.constant 0 : i32
    return %arg0, %c0_i32 : i32, i32
  }
  func.func @transform_1(%arg0: i32) -> (i32, i32) {
    %c0_i32 = arith.constant 0 : i32
    %c0_i32_0 = arith.constant 0 : i32
    return %arg0, %c0_i32 : i32, i32
  }
  func.func @transform_2(%arg0: i32) -> (i32, i32) {
    %c0_i32 = arith.constant 0 : i32
    %c0_i32_0 = arith.constant 0 : i32
    %c0_i32_1 = arith.constant 0 : i32
    return %c0_i32, %c0_i32_0 : i32, i32
  }
  func.func @transform_3(%arg0: i32) -> (i32, i32) {
    %c0_i32 = arith.constant 0 : i32
    %c0_i32_0 = arith.constant 0 : i32
    %c0_i32_1 = arith.constant 0 : i32
    return %c0_i32, %c0_i32_0 : i32, i32
  }
  func.func @transform_4(%arg0: i32) -> (i32, i32) {
    %c0_i32 = arith.constant 0 : i32
    %c0_i32_0 = arith.constant 0 : i32
    %c0_i32_1 = arith.constant 0 : i32
    return %c0_i32, %c0_i32_0 : i32, i32
  }
  func.func @transform_5(%arg0: i32) -> (i32, i32) {
    %c0_i32 = arith.constant 0 : i32
    %c0_i32_0 = arith.constant 0 : i32
    %c0_i32_1 = arith.constant 0 : i32
    return %c0_i32, %c0_i32_0 : i32, i32
  }
  func.func @transform_6(%arg0: i32) -> (i32, i32) {
    %c0_i32 = arith.constant 0 : i32
    %c0_i32_0 = arith.constant 0 : i32
    return %arg0, %c0_i32 : i32, i32
  }
}

</mosaic_0001>

<bundles_post_ra>
// kernel: tpu_custom_call.1
= control target key start
LH: loop header
LB: loop body
LE: loop exit
PB: predicated region body
PF: predicated region fallthrough
CT: control target
= control target key end

     0   :  { %s1115_s0 = inlined_call_operand.hbm [shape: f32[16,256], index: 0, kind: input, shape index: {}]   ;;  %s1116_s1 = inlined_call_operand.hbm [shape: f32[16,128], index: 1, kind: input, shape index: {}]   ;;  %s1117_s2 = inlined_call_operand.hbm [shape: f32[256,128], index: 2, kind: input, shape index: {}]   ;;  %s1118_s3 = inlined_call_operand.vmem [shape: f32[1,128], index: 3, kind: input, shape index: {}]   ;;  %s1119_s4 = inlined_call_operand.vmem [shape: f32[1,128], index: 4, kind: input, shape index: {}]   ;;  %s1120_s5 = inlined_call_operand.vmem [shape: f32[1,128], index: 5, kind: input, shape index: {}]   ;;  %s1121_s6 = inlined_call_operand.hbm [shape: f32[16,128], index: 6, kind: output, shape index: {}]  }
   0x1   :  { %1126 = sst [smem:[#allocation13_spill]] %s1115_s0 }
   0x2   :  { %1127 = sst [smem:[#allocation14_spill]] %s1117_s2 }
   0x3   :  { %11 = vsyncpa [#allocation3], 0 }
   0x4   :  { %13 = vsyncpa [#allocation3 + $0x1], 0 }
   0x5   :  { %14 = vsyncpa [#allocation6], 0 }
   0x6   :  { %16 = vsyncpa [#allocation6 + $0x1], 0 }
   0x7   :  { %17 = vsyncpa [#allocation4], 0 }
   0x8   :  { %19 = vsyncpa [#allocation4 + $0x1], 0  ;;  %s897_s21 = smov 0   ;;  %s899_s22 = smov 0  }
   0x9   :  { %s901_s23 = smov 0   ;;  %s903_s24 = smov 0  }
   0xa LB: > { %s918_s25 = sadd.s32 4294967295, %s854_s24   ;;  %s577_s26 = sadd.s32 4294967294, %s854_s24   ;;  %s854_s24 = sphi %s903_s24, %s1148_s24   ;;  %s850_s23 = sphi %s901_s23, %s1147_s23   ;;  %s846_s22 = sphi %s899_s22, %s1146_s22   ;;  %s842_s21 = sphi %s897_s21, %s1145_s21  }
   0xb   : > { %p45_p0 = scmp.ne.s32.totalorder %s846_s22, %s842_s21  ;;  %p1122_p1 = scmp.eq.s32.totalorder %s918_s25, 0 }
   0xc   : > { %p185_p3 = scmp.eq.s32.totalorder %s577_s26, 1  ;;  %p578_p5 = scmp.ge.s32.totalorder %s854_s24, 1 }
   0xd   : > { %p927_p4 = por %p1122_p1, %p45_p0  ;;  %p192_p7 = scmp.lt.s32.totalorder %s854_s24, 3 }
   0xe   : > { %p932_p6 = por %p185_p3, %p45_p0  ;;  %s856_s30 = smov [#allocation7]  }
   0xf   : > { %s1128_s27 = scalar_select %p927_p4, 1, 0 }
  0x10   : > { %s1129_s28 = scalar_select %p932_p6, 1, 0 }
  0x11   : > { %p937_p8 = pnand %p578_p5, %p192_p7  ;;  %s204_s7 = sshll.u32 %s856_s30, 4  ;;  %s205_s7 = int_to_ptr.vmem [resolvable:$true] %s204_s7 }
  0x12   : > { %s951_s9 = sadd.s32 1, %s854_s24   ;;  %s32_s10 = sadd.s32 1, %s850_s23 }
  0x13   : > { %s1130_s29 = scalar_select %p937_p8, 1, 0 }
  0x14   : > { %p644_p9 = pneg %p937_p8  ;;  %s29_s11 = ssub.s32 %s854_s24, %s951_s9 }
  0x15   : > { %s711_s12 = scalar_lea.vmem %s205_s7, 4096  ;;  %p719_p5 = scmp.lt.s32.totalorder %s205_s7, %s205_s7 }
  0x16   : > { %p946_p11 = pnand %p644_p9, %p1122_p1  ;;  %p712_p13 = scmp.ne.s32.totalorder %s205_s7, %s711_s12 }
  0x17   : > { %p720_p7 = scmp.lt.s32.totalorder %s711_s12, %s711_s12 }
  0x18   : > { %p702_p12 = pneg %p946_p11 }
  0x19   : > { %p721_p10 = por %p720_p7, %p719_p5 }
  0x1a   : > { %p714_p0 = pnand %p712_p13, %p702_p12 }
  0x1c   : > { %p715_p3 = pneg %p714_p0 }
  0x1e   : > { %p722_p2 = pnand %p721_p10, %p715_p3 }
  0x20   : > { %725 = shalt.err (!%p722_p2)
}
  0x21   : > { %s857_s13 = smov 128   ;;  %s858_s14 = smov 8  }
  0x22   : > { %s1132_s2 = sld [smem:[#allocation14_spill]]  ;;  %p30_p9 = scmp.eq.s32.totalorder %s29_s11, 0 }
  0x23   : > { %p39_p10 = scmp.ne.s32.totalorder %s850_s23, %s846_s22  ;;  %p40_p2 = scmp.eq.s32.totalorder %s854_s24, 0 }
  0x24   : > { %p660_p12 = scmp.lt.s32.totalorder %s854_s24, 2  ;;  %p1133_p0 = scmp.eq.s32.totalorder %s918_s25, 1 }
  0x25   : > { %s968_s17 = scalar_select %p30_p9, %s850_s23, %s32_s10  }
  0x26   : > { %p41_p13 = por %p40_p2, %p39_p10  ;;  %p972_p3 = por %p1133_p0, %p39_p10 }
  0x27   : > { %s977_s19 = sand.u32 1, %s850_s23   ;;  %s598_s20 = sshll.u32 %s854_s24, 8 }
  0x28   : > { %647 = dma.hbm_to_vmem [thread:$0]  (!%p946_p11), %s1132_s2, 4096, %s205_s7, [#allocation6], %s857_s13, %s857_s13, %s858_s14  }
  0x29   : > { %s1134_s18 = scalar_select %p972_p3, 1, 0 }
  0x2a   : > { %s581_s26 = sshll.u32 %s977_s19, 4  ;;  %s1135_s0 = sld [smem:[#allocation13_spill]] }
  0x2b   : > { %s231_s10 = scalar_lea.vmem [#allocation2], %s581_s26  ;;  %p986_p11 = pnand %p660_p12, %p41_p13 }
  0x2c   : > { %s239_s11 = sshll.u32 %s231_s10, 4  ;;  %s228_s14 = scalar_lea.sflag [#allocation3], %s977_s19  ;;  %s240_s11 = int_to_ptr.vmem [resolvable:$true] %s239_s11 }
  0x2d   : > { %p728_p7 = pneg %p986_p11 }
  0x30   : > { %s984_s8 = scalar_lea.hbm %s1135_s0, %s598_s20  ;;  %s731_s26 = scalar_lea.hbm %s1135_s0, 512 }
  0x31   : > { %s726_s15 = scalar_lea.hbm %s984_s8, 256  ;;  %p732_p2 = scmp.lt.s32.totalorder %s984_s8, %s1135_s0 }
  0x32   : > { %p727_p5 = scmp.ne.s32.totalorder %s984_s8, %s726_s15  ;;  %p733_p12 = scmp.lt.s32.totalorder %s731_s26, %s726_s15 }
  0x34   : > { %p729_p9 = pnand %p728_p7, %p727_p5  ;;  %p734_p13 = por %p733_p12, %p732_p2 }
  0x36   : > { %p730_p10 = pneg %p729_p9 }
  0x38   : > { %p735_p0 = pnand %p734_p13, %p730_p10 }
  0x3a   : > { %738 = shalt.err (!%p735_p0)
}
  0x3b   : > { %s739_s10 = scalar_lea.vmem %s240_s11, 256  ;;  %s859_s13 = smov [#allocation2]  }
  0x3c   : > { %p740_p1 = scmp.ne.s32.totalorder %s240_s11, %s739_s10  ;;  %s744_s2 = sshll.u32 %s859_s13, 4  ;;  %s745_s2 = int_to_ptr.vmem [resolvable:$false] %s744_s2 }
  0x3d   : > { %s746_s16 = scalar_lea.vmem %s745_s2, 512  ;;  %p747_p9 = scmp.lt.s32.totalorder %s240_s11, %s745_s2 }
  0x3e   : > { %p742_p6 = pnand %p740_p1, %p728_p7  ;;  %p748_p3 = scmp.lt.s32.totalorder %s746_s16, %s739_s10 }
  0x40   : > { %p743_p5 = pneg %p742_p6  ;;  %p749_p4 = por %p748_p3, %p747_p9 }
  0x42   : > { %p750_p8 = pnand %p749_p4, %p743_p5 }
  0x44   : > { %753 = shalt.err (!%p750_p8)
}
  0x45   : > { %651 = dma.hbm_to_vmem [thread:$0]  (!%p986_p11), %s984_s8, 256, %s240_s11, %s228_s14  }
  0x46   : > { %s584_s15 = sshll.u32 %s977_s19, 3  ;;  %s585_s20 = sshll.u32 %s854_s24, 7 }
  0x47   : > { %s1017_s13 = scalar_lea.hbm %s1116_s1, %s585_s20  ;;  %s250_s2 = scalar_lea.vmem [#allocation5], %s584_s15 }
  0x48   : > { %s257_s7 = sshll.u32 %s250_s2, 4  ;;  %s1137_s10 = sand.u32 1, %s854_s24   ;;  %s258_s7 = int_to_ptr.vmem [resolvable:$true] %s257_s7 }
  0x49   : > { %s247_s16 = scalar_lea.sflag [#allocation6], %s1137_s10  ;;  %s754_s0 = scalar_lea.hbm %s1017_s13, 128 }
  0x4a   : > { %p755_p1 = scmp.ne.s32.totalorder %s1017_s13, %s754_s0  ;;  %s759_s11 = scalar_lea.hbm %s1116_s1, 256 }
  0x4b   : > { %p760_p8 = scmp.lt.s32.totalorder %s1017_s13, %s1116_s1  ;;  %p761_p3 = scmp.lt.s32.totalorder %s759_s11, %s754_s0 }
  0x4c   : > { %p757_p4 = pnand %p755_p1, %p728_p7 }
  0x4d   : > { %p762_p10 = por %p761_p3, %p760_p8 }
  0x4e   : > { %p758_p6 = pneg %p757_p4 }
  0x50   : > { %p763_p2 = pnand %p762_p10, %p758_p6 }
  0x52   : > { %766 = shalt.err (!%p763_p2)
}
  0x53   : > { %s767_s15 = scalar_lea.vmem %s258_s7, 128  ;;  %s860_s26 = smov [#allocation5]  }
  0x54   : > { %p768_p12 = scmp.ne.s32.totalorder %s258_s7, %s767_s15  ;;  %s772_s30 = sshll.u32 %s860_s26, 4  ;;  %s773_s30 = int_to_ptr.vmem [resolvable:$false] %s772_s30 }
  0x55   : > { %s774_s2 = scalar_lea.vmem %s773_s30, 256  ;;  %p775_p5 = scmp.lt.s32.totalorder %s258_s7, %s773_s30 }
  0x56   : > { %p770_p13 = pnand %p768_p12, %p728_p7  ;;  %p776_p9 = scmp.lt.s32.totalorder %s774_s2, %s767_s15 }
  0x58   : > { %p771_p0 = pneg %p770_p13  ;;  %p777_p1 = por %p776_p9, %p775_p5 }
  0x5a   : > { %p778_p4 = pnand %p777_p1, %p771_p0 }
  0x5c   : > { %781 = shalt.err (!%p778_p4)
}
  0x5d   : > { %654 = dma.hbm_to_vmem [thread:$0]  (!%p986_p11), %s1017_s13, 128, %s258_s7, %s247_s16  }
  0x5e   : > { %p1138_p6 = scmp.ne.s32.totalorder %s1130_s29, 0 }
  0x5f   : > { %s1042_s0 = sand.u32 (!%p1138_p6), 1, %s846_s22   ;;  %p1139_p7 = scmp.ne.s32.totalorder (!%p1138_p6), %s1128_s27, 0 }
  0x60   : > { %266 = sbr.rel (%p1138_p6) target bundleno = 661 (0x295), region = 44  ;;  %s587_s10 = sshll.u32 (!%p1138_p6), %s1042_s0, 4 }
  0x61   : > { %s269_s19 = scalar_lea.sflag (!%p1138_p6), [#allocation3], %s1042_s0  ;;  %s1046_s8 = scalar_lea.vmem (!%p1138_p6), [#allocation2], %s587_s10 }
  0x65   : > { %825 = dma.done.wait (%p1139_p7), %s269_s19, 256  }
  0x66   : > { %827 = vsyncadd (%p1139_p7), %s269_s19, 4294967040  ;;  %s277_s29 = sand.u32 1, %s918_s25   ;;  %s588_s12 = sshll.u32 %s1042_s0, 3 }
  0x67   : > { %s278_s13 = scalar_lea.sflag [#allocation6], %s277_s29  ;;  %s1056_s7 = scalar_lea.vmem [#allocation5], %s588_s12 }
  0x68   : > { %829 = dma.done.wait (%p1139_p7), %s278_s13, 128  }
  0x69   : > { %831 = vsyncadd (%p1139_p7), %s278_s13, 4294967168  ;;  %p1140_p11 = scmp.eq.s32.totalorder %s918_s25, 0 }
  0x6b   : > { %833 = dma.done.wait (%p1140_p11), [#allocation6], 4096   ;;  %p1141_p8 = pmov %p1140_p11 }
  0x6c   : > { %v350_v0 = vld [vmem:[#allocation7 + $0xf8] sm:$0xff]  ;;  %v349_v2 = vld [vmem:[#allocation7 + $0xf0] sm:$0xff]  ;;  %v348_v4 = vld [vmem:[#allocation7 + $0xe8] sm:$0xff]  ;;  %s595_s26 = sshll.u32 %s918_s25, 7  ;;  %s318_s30 = scalar_lea.vmem [#allocation8], %s588_s12 }
  0x6d   : > { %835 = vsyncadd (%p1141_p8), [#allocation6], 4294963200  ;;  %v334_v1 = vld [vmem:[#allocation7 + $0x78] sm:$0xff]  ;;  %599 = vmatprep.subr.mxu0 %v350_v0  ;;  %v333_v3 = vld [vmem:[#allocation7 + $0x70] sm:$0xff]  ;;  %s475_s2 = sshll.u32 %s318_s30, 4  ;;  %s462_s29 = scalar_lea.sflag [#allocation4], %s1042_s0  ;;  %s476_s2 = int_to_ptr.vmem [resolvable:$true] %s475_s2 }
  0x6e   : > { %600 = vmatpush3.msra.mxu0 %v334_v1  ;;  %v332_v5 = vld [vmem:[#allocation7 + $0x68] sm:$0xff]  ;;  %v347_v6 = vld [vmem:[#allocation7 + $0xe0] sm:$0xff]  ;;  %v346_v8 = vld [vmem:[#allocation7 + $0xd8] sm:$0xff]  ;;  %s782_s13 = scalar_lea.vmem %s476_s2, 128  ;;  %p1142_p10 = scmp.ne.s32.totalorder %s1134_s18, 0 }
  0x6f   : > { %601 = vmatprep.subr.mxu0 %v349_v2  ;;  %v331_v7 = vld [vmem:[#allocation7 + $0x60] sm:$0xff]  ;;  %v330_v9 = vld [vmem:[#allocation7 + $0x58] sm:$0xff]  ;;  %v345_v10 = vld [vmem:[#allocation7 + $0xd0] sm:$0xff]  ;;  %p783_p3 = scmp.ne.s32.totalorder %s476_s2, %s782_s13 }
  0x70   : > { %602 = vmatpush3.msra.mxu0 %v333_v3  ;;  %v329_v11 = vld [vmem:[#allocation7 + $0x50] sm:$0xff]  ;;  %v344_v12 = vld [vmem:[#allocation7 + $0xc8] sm:$0xff]  ;;  %v343_v15 = vld [vmem:[#allocation7 + $0xc0] sm:$0xff] }
  0x71   : > { %603 = vmatprep.subr.mxu0 %v348_v4  ;;  %v355_v13 = vld [vmem:[%s1046_s8 + $0x8] sm:$0xff]  ;;  %v327_v16 = vld [vmem:[#allocation7 + $0x40] sm:$0xff]  ;;  %v341_v19 = vld [vmem:[#allocation7 + $0xb0] sm:$0xff]  ;;  %p784_p2 = pnand %p783_p3, %p1142_p10 }
  0x72   : > { %604 = vmatpush3.msra.mxu0 %v332_v5  ;;  %v328_v14 = vld [vmem:[#allocation7 + $0x48] sm:$0xff]  ;;  %426 = vmatprep.mubr.f32.mxu0 %v355_v13  ;;  %v342_v17 = vld [vmem:[#allocation7 + $0xb8] sm:$0xff]  ;;  %v325_v20 = vld [vmem:[#allocation7 + $0x30] sm:$0xff] }
  0x73   : > { %605 = vmatprep.subr.mxu0 %v347_v6  ;;  %v326_v18 = vld [vmem:[#allocation7 + $0x38] sm:$0xff]  ;;  %v340_v21 = vld [vmem:[#allocation7 + $0xa8] sm:$0xff]  ;;  %v339_v23 = vld [vmem:[#allocation7 + $0xa0] sm:$0xff]  ;;  %p785_p12 = pneg %p784_p2 }
  0x74   : > { %606 = vmatpush3.msra.mxu0 %v331_v7  ;;  %v324_v22 = vld [vmem:[#allocation7 + $0x28] sm:$0xff]  ;;  %v323_v24 = vld [vmem:[#allocation7 + $0x20] sm:$0xff]  ;;  %v338_v25 = vld [vmem:[#allocation7 + $0x98] sm:$0xff] }
  0x75   : > { %607 = vmatprep.subr.mxu0 %v346_v8  ;;  %v322_v26 = vld [vmem:[#allocation7 + $0x18] sm:$0xff]  ;;  %v337_v27 = vld [vmem:[#allocation7 + $0x90] sm:$0xff]  ;;  %v336_v29 = vld [vmem:[#allocation7 + $0x88] sm:$0xff] }
  0x76   : > { %608 = vmatpush3.msra.mxu0 %v330_v9  ;;  %v321_v28 = vld [vmem:[#allocation7 + $0x10] sm:$0xff]  ;;  %v320_v30 = vld [vmem:[#allocation7 + $0x8] sm:$0xff]  ;;  %v335_v31 = vld [vmem:[#allocation7 + $0x80] sm:$0xff] }
  0x77   : > { %609 = vmatprep.subr.mxu0 %v345_v10  ;;  %v319_v32 = vld [vmem:[#allocation7] sm:$0xff]  ;;  %v591_v35 = vld [vmem:[%s1118_s3] ss:$0 sm:$0xff] }
  0x78   : > { %610 = vmatpush3.msra.mxu0 %v329_v11  ;;  %v354_v33 = vld [vmem:[%s1046_s8] sm:$0xff]  ;;  %s473_s8 = scalar_lea.hbm %s1121_s6, %s595_s26 }
  0x79   : > { %611 = vmatprep.subr.mxu0 %v344_v12  ;;  %v432_v38 = vld [vmem:[%s1056_s7] sm:$0xff]  ;;  %s861_s7 = smov [#allocation8]  }
  0x7a   : > { %612 = vmatpush3.msra.mxu0 %v328_v14  ;;  %v592_v49 = vld [vmem:[%s1119_s4] ss:$0 sm:$0xff]  ;;  %s786_s27 = sshll.u32 %s861_s7, 4  ;;  %s787_s27 = int_to_ptr.vmem [resolvable:$false] %s786_s27 }
  0x7b   : > { %613 = vmatprep.subr.mxu0 %v343_v15  ;;  %v593_v51 = vld [vmem:[%s1120_s5] ss:$0 sm:$0xff]  ;;  %s788_s25 = scalar_lea.vmem %s787_s27, 256  ;;  %p789_p13 = scmp.lt.s32.totalorder %s476_s2, %s787_s27 }
  0x7c   : > { %614 = vmatpush3.msra.mxu0 %v327_v16  ;;  %p790_p0 = scmp.lt.s32.totalorder %s788_s25, %s782_s13 }
  0x7d   : > { %615 = vmatprep.subr.mxu0 %v342_v17 }
  0x7e   : > { %616 = vmatpush3.msra.mxu0 %v326_v18  ;;  %p791_p5 = por %p790_p0, %p789_p13 }
  0x7f   : > { %617 = vmatprep.subr.mxu0 %v341_v19 }
  0x80   : > { %618 = vmatpush3.msra.mxu0 %v325_v20  ;;  %p792_p9 = pnand %p791_p5, %p785_p12 }
  0x81   : > { %619 = vmatprep.subr.mxu0 %v340_v21 }
  0x82   : > { %620 = vmatpush3.msra.mxu0 %v324_v22 }
  0x83   : > { %621 = vmatprep.subr.mxu0 %v339_v23 }
  0x84   : > { %622 = vmatpush3.msra.mxu0 %v323_v24 }
  0x85   : > { %623 = vmatprep.subr.mxu0 %v338_v25 }
  0x86   : > { %624 = vmatpush3.msra.mxu0 %v322_v26 }
  0x87   : > { %625 = vmatprep.subr.mxu0 %v337_v27 }
  0x88   : > { %626 = vmatpush3.msra.mxu0 %v321_v28 }
  0x89   : > { %627 = vmatprep.subr.mxu0 %v336_v29 }
  0x8a   : > { %628 = vmatpush3.msra.mxu0 %v320_v30 }
  0x8b   : > { %629 = vmatprep.subr.mxu0 %v335_v31 }
  0x8c   : > { %630 = vmatpush3.msra.mxu0 %v319_v32 }
  0x8d   : > { %427 = vmatmul.mubr.f32.vlgmr.msra.gmra.mxu0 %v354_v33 }
 0x14d   : > { %v631_v34 = vpop.f32.mrf.mxu0 }
 0x14f   : > { %v632_v36 = vpop.f32.mrf.mxu0 }
 0x150   : > { %v633_v37 = vadd.f32 %v632_v36, %v631_v34 }
 0x152   : > { %v429_v39 = vadd.f32 %v633_v37, %v591_v35 }
 0x154   : > { %v433_v40 = vadd.f32 %v432_v38, %v429_v39 }
 0x156   : > { %434 = vadd.xlane.f32.xlu0 %v433_v40 }
 0x1df   : > { %v435_v41 = vpop.xlane.xlu0 %434 }
 0x1e0   : > { %v437_v42 = vmul.f32 0.0078125, %v435_v41 }
 0x1e2   : > { %v438_v43 = vsub.f32 %v433_v40, %v437_v42 }
 0x1e4   : > { %v439_v44 = vmul.f32 %v438_v43, %v438_v43 }
 0x1e6   : > { %440 = vadd.xlane.f32.xlu0 %v439_v44 }
 0x26f   : > { %v441_v45 = vpop.xlane.xlu0 %440 }
 0x270   : > { %v442_v46 = vmul.f32 0.0078125, %v441_v45 }
 0x272   : > { %v443_v47 = vadd.f32 1e-12, %v442_v46 }
 0x274   : > { %698 = vrsqrt.f32 %v443_v47 }
 0x281   : > { %v699_v48 = vpop.eup %698 }
 0x282   : > { %v445_v50 = vmul.f32 %v699_v48, %v438_v43 }
 0x284   : > { %v452_v52 = vmul.f32 %v592_v49, %v445_v50 }
 0x286   : > { %v459_v53 = vadd.f32 %v593_v51, %v452_v52 }
 0x288   : > { %460 = vst [vmem:[%s318_s30] sm:$0xff] %v459_v53 }
 0x289   : > { %795 = shalt.err (!%p792_p9)
}
 0x28a   : > { %s796_s12 = scalar_lea.hbm %s473_s8, 128  ;;  %s800_s11 = scalar_lea.hbm %s1121_s6, 256 }
 0x28b   : > { %p797_p1 = scmp.ne.s32.totalorder %s473_s8, %s796_s12  ;;  %p801_p7 = scmp.lt.s32.totalorder %s473_s8, %s1121_s6 }
 0x28c   : > { %p802_p11 = scmp.lt.s32.totalorder %s800_s11, %s796_s12 }
 0x28d   : > { %p798_p4 = pnand %p797_p1, %p1142_p10 }
 0x28e   : > { %p803_p8 = por %p802_p11, %p801_p7 }
 0x28f   : > { %p799_p6 = pneg %p798_p4 }
 0x291   : > { %p804_p3 = pnand %p803_p8, %p799_p6 }
 0x293   : > { %807 = shalt.err (!%p804_p3)
}
 0x294   : > { %642 = dma.vmem_to_hbm [thread:$0]  (%p1142_p10), %s476_s2, 128, %s473_s8, %s462_s29  }
 0x295 PF: > { %s487_s15 = sand.u32 1, %s842_s21   ;;  %p1143_p2 = scmp.ne.s32.totalorder %s1129_s28, 0 }
 0x296   : > { %p1144_p12 = scmp.ge.s32.totalorder %s854_s24, 2  ;;  %s488_s26 = scalar_lea.sflag [#allocation4], %s487_s15 }
 0x298   : > { %p656_p13 = pnand %p1144_p12, %p1143_p2 }
 0x29a   : > { %p657_p0 = pneg %p656_p13 }
 0x29c   : > { %837 = dma.done.wait (%p657_p0), %s488_s26, 128  }
 0x29d   : > { %839 = vsyncadd (%p657_p0), %s488_s26, 4294967168  ;;  %p22_p5 = scmp.ge.s32.totalorder %s951_s9, 4   ;;  %s1145_s21 = smov %s846_s22 }
 0x29e   : > { %s1146_s22 = smov %s850_s23  ;;  %s1147_s23 = smov %s968_s17 }
 0x29f   : > { %s1148_s24 = smov %s951_s9  ;;  %24 = sbr.rel (!%p22_p5) target bundleno = 10 (0xa), region = 106 }
 0x2a4   :  { %493 = vsyncpa [#allocation3], 1 }
 0x2a5   :  { %495 = vsyncpa [#allocation3 + $0x1], 1 }
 0x2a6   :  { %496 = vsyncpa [#allocation6], 1 }
 0x2a7   :  { %498 = vsyncpa [#allocation6 + $0x1], 1 }
 0x2a8   :  { %499 = vsyncpa [#allocation4], 1 }
 0x2a9   :  { %501 = vsyncpa [#allocation4 + $0x1], 1 }

// kernel: tpu_custom_call.1
= control target key start
LH: loop header
LB: loop body
LE: loop exit
PB: predicated region body
PF: predicated region fallthrough
CT: control target
= control target key end

     0   :  { %s1115_s0 = inlined_call_operand.hbm [shape: f32[16,256], index: 0, kind: input, shape index: {}]   ;;  %s1116_s1 = inlined_call_operand.hbm [shape: f32[16,128], index: 1, kind: input, shape index: {}]   ;;  %s1117_s2 = inlined_call_operand.hbm [shape: f32[256,128], index: 2, kind: input, shape index: {}]   ;;  %s1118_s3 = inlined_call_operand.vmem [shape: f32[1,128], index: 3, kind: input, shape index: {}]   ;;  %s1119_s4 = inlined_call_operand.vmem [shape: f32[1,128], index: 4, kind: input, shape index: {}]   ;;  %s1120_s5 = inlined_call_operand.vmem [shape: f32[1,128], index: 5, kind: input, shape index: {}]   ;;  %s1121_s6 = inlined_call_operand.hbm [shape: f32[16,128], index: 6, kind: output, shape index: {}]  }
   0x1   :  { %1126 = sst [smem:[#allocation13_spill]] %s1115_s0 }
   0x2   :  { %1127 = sst [smem:[#allocation14_spill]] %s1117_s2 }
   0x3   :  { %11 = vsyncpa [#allocation3], 0 }
   0x4   :  { %13 = vsyncpa [#allocation3 + $0x1], 0 }
   0x5   :  { %14 = vsyncpa [#allocation6], 0 }
   0x6   :  { %16 = vsyncpa [#allocation6 + $0x1], 0 }
   0x7   :  { %17 = vsyncpa [#allocation4], 0 }
   0x8   :  { %19 = vsyncpa [#allocation4 + $0x1], 0  ;;  %s897_s21 = smov 0   ;;  %s899_s22 = smov 0  }
   0x9   :  { %s901_s23 = smov 0   ;;  %s903_s24 = smov 0  }
   0xa LB: > { %s918_s25 = sadd.s32 4294967295, %s854_s24   ;;  %s577_s26 = sadd.s32 4294967294, %s854_s24   ;;  %s854_s24 = sphi %s903_s24, %s1148_s24   ;;  %s850_s23 = sphi %s901_s23, %s1147_s23   ;;  %s846_s22 = sphi %s899_s22, %s1146_s22   ;;  %s842_s21 = sphi %s897_s21, %s1145_s21  }
   0xb   : > { %p45_p0 = scmp.ne.s32.totalorder %s846_s22, %s842_s21  ;;  %p1122_p1 = scmp.eq.s32.totalorder %s918_s25, 0 }
   0xc   : > { %p185_p3 = scmp.eq.s32.totalorder %s577_s26, 1  ;;  %p578_p5 = scmp.ge.s32.totalorder %s854_s24, 1 }
   0xd   : > { %p927_p4 = por %p1122_p1, %p45_p0  ;;  %p192_p7 = scmp.lt.s32.totalorder %s854_s24, 3 }
   0xe   : > { %p932_p6 = por %p185_p3, %p45_p0  ;;  %s856_s30 = smov [#allocation7]  }
   0xf   : > { %s1128_s27 = scalar_select %p927_p4, 1, 0 }
  0x10   : > { %s1129_s28 = scalar_select %p932_p6, 1, 0 }
  0x11   : > { %p937_p8 = pnand %p578_p5, %p192_p7  ;;  %s204_s7 = sshll.u32 %s856_s30, 4  ;;  %s205_s7 = int_to_ptr.vmem [resolvable:$true] %s204_s7 }
  0x12   : > { %s951_s9 = sadd.s32 1, %s854_s24   ;;  %s32_s10 = sadd.s32 1, %s850_s23 }
  0x13   : > { %s1130_s29 = scalar_select %p937_p8, 1, 0 }
  0x14   : > { %p644_p9 = pneg %p937_p8  ;;  %s29_s11 = ssub.s32 %s854_s24, %s951_s9 }
  0x15   : > { %s711_s12 = scalar_lea.vmem %s205_s7, 4096  ;;  %p719_p5 = scmp.lt.s32.totalorder %s205_s7, %s205_s7 }
  0x16   : > { %p946_p11 = pnand %p644_p9, %p1122_p1  ;;  %p712_p13 = scmp.ne.s32.totalorder %s205_s7, %s711_s12 }
  0x17   : > { %p720_p7 = scmp.lt.s32.totalorder %s711_s12, %s711_s12 }
  0x18   : > { %p702_p12 = pneg %p946_p11 }
  0x19   : > { %p721_p10 = por %p720_p7, %p719_p5 }
  0x1a   : > { %p714_p0 = pnand %p712_p13, %p702_p12 }
  0x1c   : > { %p715_p3 = pneg %p714_p0 }
  0x1e   : > { %p722_p2 = pnand %p721_p10, %p715_p3 }
  0x20   : > { %725 = shalt.err (!%p722_p2)
}
  0x21   : > { %s857_s13 = smov 128   ;;  %s858_s14 = smov 8  }
  0x22   : > { %s1132_s2 = sld [smem:[#allocation14_spill]]  ;;  %p30_p9 = scmp.eq.s32.totalorder %s29_s11, 0 }
  0x23   : > { %p39_p10 = scmp.ne.s32.totalorder %s850_s23, %s846_s22  ;;  %p40_p2 = scmp.eq.s32.totalorder %s854_s24, 0 }
  0x24   : > { %p660_p12 = scmp.lt.s32.totalorder %s854_s24, 2  ;;  %p1133_p0 = scmp.eq.s32.totalorder %s918_s25, 1 }
  0x25   : > { %s968_s17 = scalar_select %p30_p9, %s850_s23, %s32_s10  }
  0x26   : > { %p41_p13 = por %p40_p2, %p39_p10  ;;  %p972_p3 = por %p1133_p0, %p39_p10 }
  0x27   : > { %s977_s19 = sand.u32 1, %s850_s23   ;;  %s598_s20 = sshll.u32 %s854_s24, 8 }
  0x28   : > { %647 = dma.hbm_to_vmem [thread:$0]  (!%p946_p11), %s1132_s2, 4096, %s205_s7, [#allocation6], %s857_s13, %s857_s13, %s858_s14  }
  0x29   : > { %s1134_s18 = scalar_select %p972_p3, 1, 0 }
  0x2a   : > { %s581_s26 = sshll.u32 %s977_s19, 4  ;;  %s1135_s0 = sld [smem:[#allocation13_spill]] }
  0x2b   : > { %s231_s10 = scalar_lea.vmem [#allocation2], %s581_s26  ;;  %p986_p11 = pnand %p660_p12, %p41_p13 }
  0x2c   : > { %s239_s11 = sshll.u32 %s231_s10, 4  ;;  %s228_s14 = scalar_lea.sflag [#allocation3], %s977_s19  ;;  %s240_s11 = int_to_ptr.vmem [resolvable:$true] %s239_s11 }
  0x2d   : > { %p728_p7 = pneg %p986_p11 }
  0x30   : > { %s984_s8 = scalar_lea.hbm %s1135_s0, %s598_s20  ;;  %s731_s26 = scalar_lea.hbm %s1135_s0, 512 }
  0x31   : > { %s726_s15 = scalar_lea.hbm %s984_s8, 256  ;;  %p732_p2 = scmp.lt.s32.totalorder %s984_s8, %s1135_s0 }
  0x32   : > { %p727_p5 = scmp.ne.s32.totalorder %s984_s8, %s726_s15  ;;  %p733_p12 = scmp.lt.s32.totalorder %s731_s26, %s726_s15 }
  0x34   : > { %p729_p9 = pnand %p728_p7, %p727_p5  ;;  %p734_p13 = por %p733_p12, %p732_p2 }
  0x36   : > { %p730_p10 = pneg %p729_p9 }
  0x38   : > { %p735_p0 = pnand %p734_p13, %p730_p10 }
  0x3a   : > { %738 = shalt.err (!%p735_p0)
}
  0x3b   : > { %s739_s10 = scalar_lea.vmem %s240_s11, 256  ;;  %s859_s13 = smov [#allocation2]  }
  0x3c   : > { %p740_p1 = scmp.ne.s32.totalorder %s240_s11, %s739_s10  ;;  %s744_s2 = sshll.u32 %s859_s13, 4  ;;  %s745_s2 = int_to_ptr.vmem [resolvable:$false] %s744_s2 }
  0x3d   : > { %s746_s16 = scalar_lea.vmem %s745_s2, 512  ;;  %p747_p9 = scmp.lt.s32.totalorder %s240_s11, %s745_s2 }
  0x3e   : > { %p742_p6 = pnand %p740_p1, %p728_p7  ;;  %p748_p3 = scmp.lt.s32.totalorder %s746_s16, %s739_s10 }
  0x40   : > { %p743_p5 = pneg %p742_p6  ;;  %p749_p4 = por %p748_p3, %p747_p9 }
  0x42   : > { %p750_p8 = pnand %p749_p4, %p743_p5 }
  0x44   : > { %753 = shalt.err (!%p750_p8)
}
  0x45   : > { %651 = dma.hbm_to_vmem [thread:$0]  (!%p986_p11), %s984_s8, 256, %s240_s11, %s228_s14  }
  0x46   : > { %s584_s15 = sshll.u32 %s977_s19, 3  ;;  %s585_s20 = sshll.u32 %s854_s24, 7 }
  0x47   : > { %s1017_s13 = scalar_lea.hbm %s1116_s1, %s585_s20  ;;  %s250_s2 = scalar_lea.vmem [#allocation5], %s584_s15 }
  0x48   : > { %s257_s7 = sshll.u32 %s250_s2, 4  ;;  %s1137_s10 = sand.u32 1, %s854_s24   ;;  %s258_s7 = int_to_ptr.vmem [resolvable:$true] %s257_s7 }
  0x49   : > { %s247_s16 = scalar_lea.sflag [#allocation6], %s1137_s10  ;;  %s754_s0 = scalar_lea.hbm %s1017_s13, 128 }
  0x4a   : > { %p755_p1 = scmp.ne.s32.totalorder %s1017_s13, %s754_s0  ;;  %s759_s11 = scalar_lea.hbm %s1116_s1, 256 }
  0x4b   : > { %p760_p8 = scmp.lt.s32.totalorder %s1017_s13, %s1116_s1  ;;  %p761_p3 = scmp.lt.s32.totalorder %s759_s11, %s754_s0 }
  0x4c   : > { %p757_p4 = pnand %p755_p1, %p728_p7 }
  0x4d   : > { %p762_p10 = por %p761_p3, %p760_p8 }
  0x4e   : > { %p758_p6 = pneg %p757_p4 }
  0x50   : > { %p763_p2 = pnand %p762_p10, %p758_p6 }
  0x52   : > { %766 = shalt.err (!%p763_p2)
}
  0x53   : > { %s767_s15 = scalar_lea.vmem %s258_s7, 128  ;;  %s860_s26 = smov [#allocation5]  }
  0x54   : > { %p768_p12 = scmp.ne.s32.totalorder %s258_s7, %s767_s15  ;;  %s772_s30 = sshll.u32 %s860_s26, 4  ;;  %s773_s30 = int_to_ptr.vmem [resolvable:$false] %s772_s30 }
  0x55   : > { %s774_s2 = scalar_lea.vmem %s773_s30, 256  ;;  %p775_p5 = scmp.lt.s32.totalorder %s258_s7, %s773_s30 }
  0x56   : > { %p770_p13 = pnand %p768_p12, %p728_p7  ;;  %p776_p9 = scmp.lt.s32.totalorder %s774_s2, %s767_s15 }
  0x58   : > { %p771_p0 = pneg %p770_p13  ;;  %p777_p1 = por %p776_p9, %p775_p5 }
  0x5a   : > { %p778_p4 = pnand %p777_p1, %p771_p0 }
  0x5c   : > { %781 = shalt.err (!%p778_p4)
}
  0x5d   : > { %654 = dma.hbm_to_vmem [thread:$0]  (!%p986_p11), %s1017_s13, 128, %s258_s7, %s247_s16  }
  0x5e   : > { %p1138_p6 = scmp.ne.s32.totalorder %s1130_s29, 0 }
  0x5f   : > { %s1042_s0 = sand.u32 (!%p1138_p6), 1, %s846_s22   ;;  %p1139_p7 = scmp.ne.s32.totalorder (!%p1138_p6), %s1128_s27, 0 }
  0x60   : > { %266 = sbr.rel (%p1138_p6) target bundleno = 661 (0x295), region = 44  ;;  %s587_s10 = sshll.u32 (!%p1138_p6), %s1042_s0, 4 }
  0x61   : > { %s269_s19 = scalar_lea.sflag (!%p1138_p6), [#allocation3], %s1042_s0  ;;  %s1046_s8 = scalar_lea.vmem (!%p1138_p6), [#allocation2], %s587_s10 }
  0x65   : > { %825 = dma.done.wait (%p1139_p7), %s269_s19, 256  }
  0x66   : > { %827 = vsyncadd (%p1139_p7), %s269_s19, 4294967040  ;;  %s277_s29 = sand.u32 1, %s918_s25   ;;  %s588_s12 = sshll.u32 %s1042_s0, 3 }
  0x67   : > { %s278_s13 = scalar_lea.sflag [#allocation6], %s277_s29  ;;  %s1056_s7 = scalar_lea.vmem [#allocation5], %s588_s12 }
  0x68   : > { %829 = dma.done.wait (%p1139_p7), %s278_s13, 128  }
  0x69   : > { %831 = vsyncadd (%p1139_p7), %s278_s13, 4294967168  ;;  %p1140_p11 = scmp.eq.s32.totalorder %s918_s25, 0 }
  0x6b   : > { %833 = dma.done.wait (%p1140_p11), [#allocation6], 4096   ;;  %p1141_p8 = pmov %p1140_p11 }
  0x6c   : > { %v350_v0 = vld [vmem:[#allocation7 + $0xf8] sm:$0xff]  ;;  %v349_v2 = vld [vmem:[#allocation7 + $0xf0] sm:$0xff]  ;;  %v348_v4 = vld [vmem:[#allocation7 + $0xe8] sm:$0xff]  ;;  %s595_s26 = sshll.u32 %s918_s25, 7  ;;  %s318_s30 = scalar_lea.vmem [#allocation8], %s588_s12 }
  0x6d   : > { %835 = vsyncadd (%p1141_p8), [#allocation6], 4294963200  ;;  %v334_v1 = vld [vmem:[#allocation7 + $0x78] sm:$0xff]  ;;  %599 = vmatprep.subr.mxu0 %v350_v0  ;;  %v333_v3 = vld [vmem:[#allocation7 + $0x70] sm:$0xff]  ;;  %s475_s2 = sshll.u32 %s318_s30, 4  ;;  %s462_s29 = scalar_lea.sflag [#allocation4], %s1042_s0  ;;  %s476_s2 = int_to_ptr.vmem [resolvable:$true] %s475_s2 }
  0x6e   : > { %600 = vmatpush3.msra.mxu0 %v334_v1  ;;  %v332_v5 = vld [vmem:[#allocation7 + $0x68] sm:$0xff]  ;;  %v347_v6 = vld [vmem:[#allocation7 + $0xe0] sm:$0xff]  ;;  %v346_v8 = vld [vmem:[#allocation7 + $0xd8] sm:$0xff]  ;;  %s782_s13 = scalar_lea.vmem %s476_s2, 128  ;;  %p1142_p10 = scmp.ne.s32.totalorder %s1134_s18, 0 }
  0x6f   : > { %601 = vmatprep.subr.mxu0 %v349_v2  ;;  %v331_v7 = vld [vmem:[#allocation7 + $0x60] sm:$0xff]  ;;  %v330_v9 = vld [vmem:[#allocation7 + $0x58] sm:$0xff]  ;;  %v345_v10 = vld [vmem:[#allocation7 + $0xd0] sm:$0xff]  ;;  %p783_p3 = scmp.ne.s32.totalorder %s476_s2, %s782_s13 }
  0x70   : > { %602 = vmatpush3.msra.mxu0 %v333_v3  ;;  %v329_v11 = vld [vmem:[#allocation7 + $0x50] sm:$0xff]  ;;  %v344_v12 = vld [vmem:[#allocation7 + $0xc8] sm:$0xff]  ;;  %v343_v15 = vld [vmem:[#allocation7 + $0xc0] sm:$0xff] }
  0x71   : > { %603 = vmatprep.subr.mxu0 %v348_v4  ;;  %v355_v13 = vld [vmem:[%s1046_s8 + $0x8] sm:$0xff]  ;;  %v327_v16 = vld [vmem:[#allocation7 + $0x40] sm:$0xff]  ;;  %v341_v19 = vld [vmem:[#allocation7 + $0xb0] sm:$0xff]  ;;  %p784_p2 = pnand %p783_p3, %p1142_p10 }
  0x72   : > { %604 = vmatpush3.msra.mxu0 %v332_v5  ;;  %v328_v14 = vld [vmem:[#allocation7 + $0x48] sm:$0xff]  ;;  %426 = vmatprep.mubr.f32.mxu0 %v355_v13  ;;  %v342_v17 = vld [vmem:[#allocation7 + $0xb8] sm:$0xff]  ;;  %v325_v20 = vld [vmem:[#allocation7 + $0x30] sm:$0xff] }
  0x73   : > { %605 = vmatprep.subr.mxu0 %v347_v6  ;;  %v326_v18 = vld [vmem:[#allocation7 + $0x38] sm:$0xff]  ;;  %v340_v21 = vld [vmem:[#allocation7 + $0xa8] sm:$0xff]  ;;  %v339_v23 = vld [vmem:[#allocation7 + $0xa0] sm:$0xff]  ;;  %p785_p12 = pneg %p784_p2 }
  0x74   : > { %606 = vmatpush3.msra.mxu0 %v331_v7  ;;  %v324_v22 = vld [vmem:[#allocation7 + $0x28] sm:$0xff]  ;;  %v323_v24 = vld [vmem:[#allocation7 + $0x20] sm:$0xff]  ;;  %v338_v25 = vld [vmem:[#allocation7 + $0x98] sm:$0xff] }
  0x75   : > { %607 = vmatprep.subr.mxu0 %v346_v8  ;;  %v322_v26 = vld [vmem:[#allocation7 + $0x18] sm:$0xff]  ;;  %v337_v27 = vld [vmem:[#allocation7 + $0x90] sm:$0xff]  ;;  %v336_v29 = vld [vmem:[#allocation7 + $0x88] sm:$0xff] }
  0x76   : > { %608 = vmatpush3.msra.mxu0 %v330_v9  ;;  %v321_v28 = vld [vmem:[#allocation7 + $0x10] sm:$0xff]  ;;  %v320_v30 = vld [vmem:[#allocation7 + $0x8] sm:$0xff]  ;;  %v335_v31 = vld [vmem:[#allocation7 + $0x80] sm:$0xff] }
  0x77   : > { %609 = vmatprep.subr.mxu0 %v345_v10  ;;  %v319_v32 = vld [vmem:[#allocation7] sm:$0xff]  ;;  %v591_v35 = vld [vmem:[%s1118_s3] ss:$0 sm:$0xff] }
  0x78   : > { %610 = vmatpush3.msra.mxu0 %v329_v11  ;;  %v354_v33 = vld [vmem:[%s1046_s8] sm:$0xff]  ;;  %s473_s8 = scalar_lea.hbm %s1121_s6, %s595_s26 }
  0x79   : > { %611 = vmatprep.subr.mxu0 %v344_v12  ;;  %v432_v38 = vld [vmem:[%s1056_s7] sm:$0xff]  ;;  %s861_s7 = smov [#allocation8]  }
  0x7a   : > { %612 = vmatpush3.msra.mxu0 %v328_v14  ;;  %v592_v49 = vld [vmem:[%s1119_s4] ss:$0 sm:$0xff]  ;;  %s786_s27 = sshll.u32 %s861_s7, 4  ;;  %s787_s27 = int_to_ptr.vmem [resolvable:$false] %s786_s27 }
  0x7b   : > { %613 = vmatprep.subr.mxu0 %v343_v15  ;;  %v593_v51 = vld [vmem:[%s1120_s5] ss:$0 sm:$0xff]  ;;  %s788_s25 = scalar_lea.vmem %s787_s27, 256  ;;  %p789_p13 = scmp.lt.s32.totalorder %s476_s2, %s787_s27 }
  0x7c   : > { %614 = vmatpush3.msra.mxu0 %v327_v16  ;;  %p790_p0 = scmp.lt.s32.totalorder %s788_s25, %s782_s13 }
  0x7d   : > { %615 = vmatprep.subr.mxu0 %v342_v17 }
  0x7e   : > { %616 = vmatpush3.msra.mxu0 %v326_v18  ;;  %p791_p5 = por %p790_p0, %p789_p13 }
  0x7f   : > { %617 = vmatprep.subr.mxu0 %v341_v19 }
  0x80   : > { %618 = vmatpush3.msra.mxu0 %v325_v20  ;;  %p792_p9 = pnand %p791_p5, %p785_p12 }
  0x81   : > { %619 = vmatprep.subr.mxu0 %v340_v21 }
  0x82   : > { %620 = vmatpush3.msra.mxu0 %v324_v22 }
  0x83   : > { %621 = vmatprep.subr.mxu0 %v339_v23 }
  0x84   : > { %622 = vmatpush3.msra.mxu0 %v323_v24 }
  0x85   : > { %623 = vmatprep.subr.mxu0 %v338_v25 }
  0x86   : > { %624 = vmatpush3.msra.mxu0 %v322_v26 }
  0x87   : > { %625 = vmatprep.subr.mxu0 %v337_v27 }
  0x88   : > { %626 = vmatpush3.msra.mxu0 %v321_v28 }
  0x89   : > { %627 = vmatprep.subr.mxu0 %v336_v29 }
  0x8a   : > { %628 = vmatpush3.msra.mxu0 %v320_v30 }
  0x8b   : > { %629 = vmatprep.subr.mxu0 %v335_v31 }
  0x8c   : > { %630 = vmatpush3.msra.mxu0 %v319_v32 }
  0x8d   : > { %427 = vmatmul.mubr.f32.vlgmr.msra.gmra.mxu0 %v354_v33 }
 0x14d   : > { %v631_v34 = vpop.f32.mrf.mxu0 }
 0x14f   : > { %v632_v36 = vpop.f32.mrf.mxu0 }
 0x150   : > { %v633_v37 = vadd.f32 %v632_v36, %v631_v34 }
 0x152   : > { %v429_v39 = vadd.f32 %v633_v37, %v591_v35 }
 0x154   : > { %v433_v40 = vadd.f32 %v432_v38, %v429_v39 }
 0x156   : > { %434 = vadd.xlane.f32.xlu0 %v433_v40 }
 0x1df   : > { %v435_v41 = vpop.xlane.xlu0 %434 }
 0x1e0   : > { %v437_v42 = vmul.f32 0.0078125, %v435_v41 }
 0x1e2   : > { %v438_v43 = vsub.f32 %v433_v40, %v437_v42 }
 0x1e4   : > { %v439_v44 = vmul.f32 %v438_v43, %v438_v43 }
 0x1e6   : > { %440 = vadd.xlane.f32.xlu0 %v439_v44 }
 0x26f   : > { %v441_v45 = vpop.xlane.xlu0 %440 }
 0x270   : > { %v442_v46 = vmul.f32 0.0078125, %v441_v45 }
 0x272   : > { %v443_v47 = vadd.f32 1e-12, %v442_v46 }
 0x274   : > { %698 = vrsqrt.f32 %v443_v47 }
 0x281   : > { %v699_v48 = vpop.eup %698 }
 0x282   : > { %v445_v50 = vmul.f32 %v699_v48, %v438_v43 }
 0x284   : > { %v452_v52 = vmul.f32 %v592_v49, %v445_v50 }
 0x286   : > { %v459_v53 = vadd.f32 %v593_v51, %v452_v52 }
 0x288   : > { %460 = vst [vmem:[%s318_s30] sm:$0xff] %v459_v53 }
 0x289   : > { %795 = shalt.err (!%p792_p9)
}
 0x28a   : > { %s796_s12 = scalar_lea.hbm %s473_s8, 128  ;;  %s800_s11 = scalar_lea.hbm %s1121_s6, 256 }
 0x28b   : > { %p797_p1 = scmp.ne.s32.totalorder %s473_s8, %s796_s12  ;;  %p801_p7 = scmp.lt.s32.totalorder %s473_s8, %s1121_s6 }
 0x28c   : > { %p802_p11 = scmp.lt.s32.totalorder %s800_s11, %s796_s12 }
 0x28d   : > { %p798_p4 = pnand %p797_p1, %p1142_p10 }
 0x28e   : > { %p803_p8 = por %p802_p11, %p801_p7 }
 0x28f   : > { %p799_p6 = pneg %p798_p4 }
 0x291   : > { %p804_p3 = pnand %p803_p8, %p799_p6 }
 0x293   : > { %807 = shalt.err (!%p804_p3)
}
 0x294   : > { %642 = dma.vmem_to_hbm [thread:$0]  (%p1142_p10), %s476_s2, 128, %s473_s8, %s462_s29  }
 0x295 PF: > { %s487_s15 = sand.u32 1, %s842_s21   ;;  %p1143_p2 = scmp.ne.s32.totalorder %s1129_s28, 0 }
 0x296   : > { %p1144_p12 = scmp.ge.s32.totalorder %s854_s24, 2  ;;  %s488_s26 = scalar_lea.sflag [#allocation4], %s487_s15 }
 0x298   : > { %p656_p13 = pnand %p1144_p12, %p1143_p2 }
 0x29a   : > { %p657_p0 = pneg %p656_p13 }
 0x29c   : > { %837 = dma.done.wait (%p657_p0), %s488_s26, 128  }
 0x29d   : > { %839 = vsyncadd (%p657_p0), %s488_s26, 4294967168  ;;  %p22_p5 = scmp.ge.s32.totalorder %s951_s9, 4   ;;  %s1145_s21 = smov %s846_s22 }
 0x29e   : > { %s1146_s22 = smov %s850_s23  ;;  %s1147_s23 = smov %s968_s17 }
 0x29f   : > { %s1148_s24 = smov %s951_s9  ;;  %24 = sbr.rel (!%p22_p5) target bundleno = 10 (0xa), region = 106 }
 0x2a4   :  { %493 = vsyncpa [#allocation3], 1 }
 0x2a5   :  { %495 = vsyncpa [#allocation3 + $0x1], 1 }
 0x2a6   :  { %496 = vsyncpa [#allocation6], 1 }
 0x2a7   :  { %498 = vsyncpa [#allocation6 + $0x1], 1 }
 0x2a8   :  { %499 = vsyncpa [#allocation4], 1 }
 0x2a9   :  { %501 = vsyncpa [#allocation4 + $0x1], 1 }

</bundles_post_ra>
